<compile_context>
chip_gen: v6e
topology: v6e:2x2x1
jax: 0.10.0
libtpu: 0.0.40
codegen_flags: <defaults>
</compile_context>

<pallas_src>
import math
from functools import partial

import jax
import jax.numpy as jnp
import numpy as np
from jax.experimental import pallas as pl
from jax.experimental.pallas import tpu as pltpu

LRELU_SLOPE = 0.1

# Time-tile (lane) width for the blocked/pipelined path.  Multiple of 128 so
# output stores are unmasked and lane-dense.  Per-generation guidance:
#   v5e: 512, v6e: 1024-2048, v7x: keep <= 1024 (64 MiB VMEM per TensorCore).
MAX_TIME_TILE = 1024
VMEM_LIMIT_BYTES = 32 * 1024 * 1024


# ------------------------------ tiling helpers ----------------------------- #
def _time_tiling(t_out, max_tile):
    """Pick (tile, n_tiles, padded_t_out) for the time axis."""
    if t_out <= max_tile:
        return t_out, 1, t_out          # single block == full dim (always legal)
    assert max_tile % 128 == 0, "time tile must be a multiple of 128 lanes"
    n_t = pl.cdiv(t_out, max_tile)
    return max_tile, n_t, n_t * max_tile


def _pad_or_trunc(a, length):
    cur = a.shape[-1]
    if cur >= length:
        return a[..., :length]
    pad = [(0, 0)] * (a.ndim - 1) + [(0, length - cur)]
    return jnp.pad(a, pad)


# ----------------------------- Conv1d kernel ------------------------------- #
def _conv_kernel(*refs, K, s, n_out, halo, has_next, apply_lrelu, slope):
    """One (group, batch, time-tile) step of a grouped Conv1d.

    K shifted (copg, cpg) x (cpg, n_out) MXU matmuls accumulated into an f32
    VMEM scratch, followed by fused bias add + optional LeakyReLU.
    """
    if has_next:
        xc_ref, xn_ref, w_ref, b_ref, o_ref, acc_ref, win_ref = refs
        # Assemble the haloed window: current tile + first `halo` cols of next.
        win_ref[:, :, :n_out] = xc_ref[...]
        if halo > 0:
            win_ref[:, :, n_out:] = xn_ref[:, :, :halo]
    else:
        xc_ref, w_ref, b_ref, o_ref, acc_ref = refs
        win_ref = xc_ref                 # single block already holds the window

    acc_ref[...] = jnp.zeros_like(acc_ref)
    for k in range(K):                   # static, fully unrolled tap loop
        r, kq = k % s, k // s            # stride phase / in-phase offset
        xs = win_ref[r, :, kq:kq + n_out]            # (cpg, n_out) contiguous
        wk = w_ref[k]                                # (copg, cpg)
        acc_ref[...] += jnp.dot(wk, xs, preferred_element_type=jnp.float32)

    out = acc_ref[...] + b_ref[...]                  # f32 bias add
    if apply_lrelu:
        out = jnp.where(out >= 0, out, slope * out)  # f32 epilogue (v5e-safe)
    o_ref[...] = out.astype(o_ref.dtype)


def conv1d_pallas(x, w, b, *, stride, padding, groups, apply_lrelu,
                  slope=LRELU_SLOPE, mxu_dtype=None,
                  max_time_tile=MAX_TIME_TILE):
    """Grouped 1-D conv (+ bias, optional fused LeakyReLU), zero padding.

    x: (B, Cin, T), w: (Cout, Cin//groups, K), b: (Cout,) -> (B, Cout, Tout)
    """
    B, Cin, T = x.shape
    Cout, cpg, K = w.shape
    G = groups
    copg = Cout // G
    s = stride
    Tout = (T + 2 * padding - K) // s + 1
    Kq = -(-K // s)                      # taps per stride phase
    halo = Kq - 1                        # extra columns needed past a tile

    n_out, n_t, Tout_p = _time_tiling(Tout, max_time_tile)
    tiled = n_t > 1
    if tiled:
        assert halo <= n_out, "time tile must cover the conv halo"
        Lph = (n_t + 1) * n_out          # one extra (zero) block for last halo
    else:
        Lph = n_out + halo               # single full-window block

    # --- host glue: zero-pad + split into stride phases (no K-fold copy) ---
    xg = x.reshape(B, G, cpg, T)                           # free (split dims)
    xgp = jnp.pad(xg, ((0, 0), (0, 0), (0, 0), (padding, padding)))
    xph = jnp.stack([_pad_or_trunc(xgp[..., r::s], Lph) for r in range(s)],
                    axis=2)                                # (B, G, s, cpg, Lph)
    wt = w.reshape(G, copg, cpg, K).transpose(0, 3, 1, 2)  # (G, K, copg, cpg)
    bt = b.reshape(G, copg, 1)

    if mxu_dtype is not None:            # bf16 MXU inputs (v6e/v7x); f32 accum
        xph = xph.astype(mxu_dtype)
        wt = wt.astype(mxu_dtype)

    kernel = partial(_conv_kernel, K=K, s=s, n_out=n_out, halo=halo,
                     has_next=tiled, apply_lrelu=apply_lrelu, slope=slope)

    if tiled:
        x_specs = [
            pl.BlockSpec((None, None, s, cpg, n_out),
                         lambda gi, bi, ti: (bi, gi, 0, 0, ti)),
            pl.BlockSpec((None, None, s, cpg, n_out),
                         lambda gi, bi, ti: (bi, gi, 0, 0, ti + 1)),
        ]
        x_args = [xph, xph]
    else:
        x_specs = [pl.BlockSpec((None, None, s, cpg, Lph),
                                lambda gi, bi, ti: (bi, gi, 0, 0, 0))]
        x_args = [xph]

    # weights/bias indexed only by the outermost (group) grid axis -> they stay
    # resident in VMEM across the inner (batch, time) loops.
    in_specs = x_specs + [
        pl.BlockSpec((None, K, copg, cpg), lambda gi, bi, ti: (gi, 0, 0, 0)),
        pl.BlockSpec((None, copg, 1), lambda gi, bi, ti: (gi, 0, 0)),
    ]

    scratch = [pltpu.VMEM((copg, n_out), jnp.float32)]     # f32 accumulator
    if tiled:
        scratch.append(pltpu.VMEM((s, cpg, n_out + halo), xph.dtype))

    out = pl.pallas_call(
        kernel,
        out_shape=jax.ShapeDtypeStruct((B, G, copg, Tout_p), x.dtype),
        grid=(G, B, n_t),
        in_specs=in_specs,
        out_specs=pl.BlockSpec((None, None, copg, n_out),
                               lambda gi, bi, ti: (bi, gi, 0, ti)),
        scratch_shapes=scratch,
        compiler_params=pltpu.CompilerParams(
            dimension_semantics=("parallel", "parallel", "parallel"),
            vmem_limit_bytes=VMEM_LIMIT_BYTES),
    )(*x_args, wt, bt)

    out = out.reshape(B, Cout, Tout_p)   # adjacent-dim merge: no copy
    if Tout_p != Tout:
        out = out[:, :, :Tout]
    return out


# ------------------------------ AvgPool kernel ----------------------------- #
def _avgpool4_kernel(xs_ref, o_ref):
    # xs_ref: (4, C, n) -- the 4 stride-2 phase-shifted taps; pure VPU work.
    x = xs_ref[...]
    o_ref[...] = (0.25 * (x[0] + x[1] + x[2] + x[3])).astype(o_ref.dtype)


def avg_pool1d_pallas(x, *, max_time_tile=MAX_TIME_TILE):
    """nn.AvgPool1d(4, 2, 2), count_include_pad=True, as a VPU shifted-add."""
    B, C, T = x.shape
    Tout = T // 2 + 1                      # (T + 2*2 - 4)//2 + 1
    n_out, n_t, Tout_p = _time_tiling(Tout, max_time_tile)

    xp = jnp.pad(x, ((0, 0), (0, 0), (2, 2)))
    # 4 stride-2 phase-shifted views of xp; XLA fuses these into one pass.
    cols = jnp.stack([_pad_or_trunc(xp[:, :, k::2], Tout_p) for k in range(4)],
                     axis=1)                               # (B, 4, C, Tout_p)

    out = pl.pallas_call(
        _avgpool4_kernel,
        out_shape=jax.ShapeDtypeStruct((B, C, Tout_p), x.dtype),
        grid=(B, n_t),
        in_specs=[pl.BlockSpec((None, 4, C, n_out),
                               lambda bi, ti: (bi, 0, 0, ti))],
        out_specs=pl.BlockSpec((None, C, n_out), lambda bi, ti: (bi, 0, ti)),
        compiler_params=pltpu.CompilerParams(
            dimension_semantics=("parallel", "parallel"),
            vmem_limit_bytes=VMEM_LIMIT_BYTES),
    )(cols)
    return out if Tout_p == Tout else out[:, :, :Tout]


# ------------------------------ model glue --------------------------------- #
def discriminator_block(x, block_params, kernels, strides, groups_list,
                        mxu_dtype=None):
    fmaps = []
    n = len(block_params)
    for i, (w, b) in enumerate(block_params):
        lrelu = i + 1 < n
        x = conv1d_pallas(x, w, b, stride=strides[i],
                          padding=kernels[i] // 2, groups=groups_list[i],
                          apply_lrelu=lrelu, mxu_dtype=mxu_dtype)
        if lrelu:
            fmaps.append(x)
    fmaps.append(x)
    return x, fmaps


def multi_scale_discriminator(wav, params, kernels, strides, groups_list,
                              mxu_dtype=None):
    fmaps = []
    x = wav
    nblocks = len(params)
    for i, bp in enumerate(params):
        x, f = discriminator_block(x, bp, kernels, strides, groups_list,
                                   mxu_dtype=mxu_dtype)
        fmaps.extend(f)
        if i + 1 < nblocks:
            x = avg_pool1d_pallas(x)
    x = x.reshape(x.shape[0], -1)          # torch.flatten(x, 1, -1)
    return x, fmaps


def init_params(key, channels_list, kernels, groups_list, num_blocks=3):
    # Deterministic PyTorch-style uniform(-1/sqrt(fan_in), 1/sqrt(fan_in)) init
    # for the *effective* conv weights (WN/SN are pure reparameterizations).
    params = []
    for _ in range(num_blocks):
        block = []
        for i in range(len(channels_list)):
            cin = 1 if i == 0 else channels_list[i - 1]
            cout = channels_list[i]
            cpg = cin // groups_list[i]
            bound = 1.0 / math.sqrt(cpg * kernels[i])
            key, kw, kb = jax.random.split(key, 3)
            w = jax.random.uniform(kw, (cout, cpg, kernels[i]), jnp.float32,
                                   -bound, bound)
            b = jax.random.uniform(kb, (cout,), jnp.float32, -bound, bound)
            block.append((w, b))
        params.append(block)
    return params


# ------------------------- pure-JAX reference ------------------------------ #
def _conv1d_ref(x, w, b, stride, padding, groups):
    out = jax.lax.conv_general_dilated(
        x, w, window_strides=(stride,), padding=[(padding, padding)],
        dimension_numbers=("NCH", "OIH", "NCH"),
        feature_group_count=groups, precision=jax.lax.Precision.HIGHEST)
    return out + b[None, :, None]


def msd_ref(wav, params, kernels, strides, groups_list):
    fmaps = []
    x = wav
    for bi, bp in enumerate(params):
        n = len(bp)
        for i, (w, b) in enumerate(bp):
            x = _conv1d_ref(x, w, b, strides[i], kernels[i] // 2,
                            groups_list[i])
            if i + 1 < n:
                x = jnp.where(x >= 0, x, LRELU_SLOPE * x)
                fmaps.append(x)
        fmaps.append(x)
        if bi + 1 < len(params):
            C = x.shape[1]
            x = _conv1d_ref(x, jnp.full((C, 1, 4), 0.25, x.dtype),
                            jnp.zeros((C,), x.dtype), 2, 2, C)
    return x.reshape(x.shape[0], -1), fmaps


# --------------------------------- main ------------------------------------ #
if __name__ == "__main__":
    channels_list = [4, 8, 8, 1]   # last conv -> 1 channel (fed to AvgPool/next block)
    kernels = [5, 5, 3, 3]
    strides = [1, 2, 1, 1]
    groups_list = [1, 2, 2, 1]

    key = jax.random.PRNGKey(0)
    kp, kx = jax.random.split(key)
    params = init_params(kp, channels_list, kernels, groups_list)
    wav = jax.random.normal(kx, (2, 1, 16), dtype=jnp.float32)

    # ---- full MSD forward (f32), strict check against lax.conv reference ----
    score, fmaps = multi_scale_discriminator(wav, params, kernels, strides,
                                             groups_list)
    score = jax.block_until_ready(score)
    fmaps = [jax.block_until_ready(f) for f in fmaps]

    ref_score, ref_fmaps = msd_ref(wav, params, kernels, strides, groups_list)
    assert score.shape == (2, 1)
    assert len(fmaps) == 3 * len(channels_list) == len(ref_fmaps)
    np.testing.assert_allclose(np.asarray(score), np.asarray(ref_score),
                               rtol=5e-3, atol=5e-3)
    for a, r in zip(fmaps, ref_fmaps):
        np.testing.assert_allclose(np.asarray(a), np.asarray(r),
                                   rtol=5e-3, atol=5e-3)

    # ---- exercise the time-tiled (haloed, multi-block) conv path ----
    xl = jax.random.normal(jax.random.PRNGKey(1), (2, 4, 1500), jnp.float32)
    wl = 0.1 * jax.random.normal(jax.random.PRNGKey(2), (8, 2, 5), jnp.float32)
    bl = 0.1 * jax.random.normal(jax.random.PRNGKey(3), (8,), jnp.float32)
    yr_by_stride = {}
    for sd in (1, 2):
        yk = conv1d_pallas(xl, wl, bl, stride=sd, padding=2, groups=2,
                           apply_lrelu=True, max_time_tile=256)
        yk = jax.block_until_ready(yk)
        yr = _conv1d_ref(xl, wl, bl, sd, 2, 2)
        yr = jnp.where(yr >= 0, yr, LRELU_SLOPE * yr)
        yr_by_stride[sd] = yr
        np.testing.assert_allclose(np.asarray(yk), np.asarray(yr),
                                   rtol=5e-3, atol=5e-3)

    # ---- exercise the tiled VPU avg-pool path ----
    xpool = jax.random.normal(jax.random.PRNGKey(4), (2, 1, 1500), jnp.float32)
    ypk = jax.block_until_ready(avg_pool1d_pallas(xpool, max_time_tile=256))
    ypr = _conv1d_ref(xpool, jnp.full((1, 1, 4), 0.25, jnp.float32),
                      jnp.zeros((1,), jnp.float32), 2, 2, 1)
    np.testing.assert_allclose(np.asarray(ypk), np.asarray(ypr),
                               rtol=5e-3, atol=5e-3)

    # ---- bf16 MXU path (v6e/v7x recommendation), f32 accumulation ----
    yb = conv1d_pallas(xl, wl, bl, stride=1, padding=2, groups=2,
                       apply_lrelu=True, max_time_tile=256,
                       mxu_dtype=jnp.bfloat16)
    yb = jax.block_until_ready(yb)
    np.testing.assert_allclose(np.asarray(yb), np.asarray(yr_by_stride[1]),
                               rtol=5e-2, atol=5e-2)

    print("KERNEL_OK")
</pallas_src>

<mosaic_0001>
module attributes {stable_mosaic.version = 11 : i64} {
  func.func @_conv_kernel(%arg0: i32, %arg1: i32, %arg2: i32, %arg3: memref<1x1x1x1x20xf32, #tpu.memory_space<vmem>>, %arg4: memref<1x5x4x1xf32, #tpu.memory_space<vmem>>, %arg5: memref<1x4x1xf32, #tpu.memory_space<vmem>>, %arg6: memref<1x1x4x16xf32, #tpu.memory_space<vmem>>, %arg7: memref<4x16xf32, #tpu.memory_space<vmem>>) attributes {dimension_semantics = [#tpu.dimension_semantics<parallel>, #tpu.dimension_semantics<parallel>, #tpu.dimension_semantics<parallel>], iteration_bounds = array<i64: 1, 2, 1>, scalar_prefetch = 0 : i64, scratch_operands = 1 : i64, tpu.core_type = #tpu.core_type<tc>, window_params = [{transform_indices = @transform_0, window_bounds = array<i64: 1, 1, 1, 1, 20>}, {transform_indices = @transform_1, window_bounds = array<i64: 1, 5, 4, 1>}, {transform_indices = @transform_2, window_bounds = array<i64: 1, 4, 1>}, {transform_indices = @transform_3, window_bounds = array<i64: 1, 1, 4, 16>}]} {
    %cst = arith.constant 0.000000e+00 : f32
    %0 = vector.broadcast %cst : f32 to vector<4x16xf32>
    %c0 = arith.constant 0 : index
    %c0_0 = arith.constant 0 : index
    %1 = vector.load %arg7[%c0, %c0_0] : memref<4x16xf32, #tpu.memory_space<vmem>>, vector<4x16xf32>
    tpu.vector_store %arg7[%c0, %c0_0], %0 {strides = array<i32>} : memref<4x16xf32, #tpu.memory_space<vmem>>, vector<4x16xf32>,
    %c0_1 = arith.constant 0 : index
    %c0_2 = arith.constant 0 : index
    %c0_3 = arith.constant 0 : index
    %c0_4 = arith.constant 0 : index
    %c0_5 = arith.constant 0 : index
    %2 = vector.load %arg3[%c0_1, %c0_2, %c0_3, %c0_4, %c0_5] : memref<1x1x1x1x20xf32, #tpu.memory_space<vmem>>, vector<1x1x1x1x16xf32>
    %3 = vector.shape_cast %2 : vector<1x1x1x1x16xf32> to vector<1x16xf32>
    %c0_6 = arith.constant 0 : index
    %c0_7 = arith.constant 0 : index
    %c0_8 = arith.constant 0 : index
    %c0_9 = arith.constant 0 : index
    %4 = vector.load %arg4[%c0_6, %c0_7, %c0_8, %c0_9] : memref<1x5x4x1xf32, #tpu.memory_space<vmem>>, vector<1x1x4x1xf32>
    %5 = vector.shape_cast %4 : vector<1x1x4x1xf32> to vector<4x1xf32>
    %c0_10 = arith.constant 0 : index
    %c0_11 = arith.constant 0 : index
    %6 = vector.load %arg7[%c0_10, %c0_11] : memref<4x16xf32, #tpu.memory_space<vmem>>, vector<4x16xf32>
    %cst_12 = arith.constant dense<0.000000e+00> : vector<4x16xf32>
    %7 = tpu.matmul %5, %3, %cst_12 {dimension_numbers = #tpu.dot_dimension_numbers<[1], [0], [0], [1], [0, 0, 1, 1], [], []>} : vector<4x1xf32>, vector<1x16xf32>, vector<4x16xf32> -> vector<4x16xf32>
    %8 = arith.addf %6, %7 : vector<4x16xf32>
    %c0_13 = arith.constant 0 : index
    %c0_14 = arith.constant 0 : index
    %9 = vector.load %arg7[%c0_13, %c0_14] : memref<4x16xf32, #tpu.memory_space<vmem>>, vector<4x16xf32>
    tpu.vector_store %arg7[%c0_13, %c0_14], %8 {strides = array<i32>} : memref<4x16xf32, #tpu.memory_space<vmem>>, vector<4x16xf32>,
    %c0_15 = arith.constant 0 : index
    %c0_16 = arith.constant 0 : index
    %c0_17 = arith.constant 0 : index
    %c0_18 = arith.constant 0 : index
    %c1 = arith.constant 1 : index
    %10 = vector.load %arg3[%c0_15, %c0_16, %c0_17, %c0_18, %c1] : memref<1x1x1x1x20xf32, #tpu.memory_space<vmem>>, vector<1x1x1x1x16xf32>
    %11 = vector.shape_cast %10 : vector<1x1x1x1x16xf32> to vector<1x16xf32>
    %c0_19 = arith.constant 0 : index
    %c1_20 = arith.constant 1 : index
    %c0_21 = arith.constant 0 : index
    %c0_22 = arith.constant 0 : index
    %12 = vector.load %arg4[%c0_19, %c1_20, %c0_21, %c0_22] : memref<1x5x4x1xf32, #tpu.memory_space<vmem>>, vector<1x1x4x1xf32>
    %13 = vector.shape_cast %12 : vector<1x1x4x1xf32> to vector<4x1xf32>
    %c0_23 = arith.constant 0 : index
    %c0_24 = arith.constant 0 : index
    %14 = vector.load %arg7[%c0_23, %c0_24] : memref<4x16xf32, #tpu.memory_space<vmem>>, vector<4x16xf32>
    %cst_25 = arith.constant dense<0.000000e+00> : vector<4x16xf32>
    %15 = tpu.matmul %13, %11, %cst_25 {dimension_numbers = #tpu.dot_dimension_numbers<[1], [0], [0], [1], [0, 0, 1, 1], [], []>} : vector<4x1xf32>, vector<1x16xf32>, vector<4x16xf32> -> vector<4x16xf32>
    %16 = arith.addf %14, %15 : vector<4x16xf32>
    %c0_26 = arith.constant 0 : index
    %c0_27 = arith.constant 0 : index
    %17 = vector.load %arg7[%c0_26, %c0_27] : memref<4x16xf32, #tpu.memory_space<vmem>>, vector<4x16xf32>
    tpu.vector_store %arg7[%c0_26, %c0_27], %16 {strides = array<i32>} : memref<4x16xf32, #tpu.memory_space<vmem>>, vector<4x16xf32>,
    %c0_28 = arith.constant 0 : index
    %c0_29 = arith.constant 0 : index
    %c0_30 = arith.constant 0 : index
    %c0_31 = arith.constant 0 : index
    %c2 = arith.constant 2 : index
    %18 = vector.load %arg3[%c0_28, %c0_29, %c0_30, %c0_31, %c2] : memref<1x1x1x1x20xf32, #tpu.memory_space<vmem>>, vector<1x1x1x1x16xf32>
    %19 = vector.shape_cast %18 : vector<1x1x1x1x16xf32> to vector<1x16xf32>
    %c0_32 = arith.constant 0 : index
    %c2_33 = arith.constant 2 : index
    %c0_34 = arith.constant 0 : index
    %c0_35 = arith.constant 0 : index
    %20 = vector.load %arg4[%c0_32, %c2_33, %c0_34, %c0_35] : memref<1x5x4x1xf32, #tpu.memory_space<vmem>>, vector<1x1x4x1xf32>
    %21 = vector.shape_cast %20 : vector<1x1x4x1xf32> to vector<4x1xf32>
    %c0_36 = arith.constant 0 : index
    %c0_37 = arith.constant 0 : index
    %22 = vector.load %arg7[%c0_36, %c0_37] : memref<4x16xf32, #tpu.memory_space<vmem>>, vector<4x16xf32>
    %cst_38 = arith.constant dense<0.000000e+00> : vector<4x16xf32>
    %23 = tpu.matmul %21, %19, %cst_38 {dimension_numbers = #tpu.dot_dimension_numbers<[1], [0], [0], [1], [0, 0, 1, 1], [], []>} : vector<4x1xf32>, vector<1x16xf32>, vector<4x16xf32> -> vector<4x16xf32>
    %24 = arith.addf %22, %23 : vector<4x16xf32>
    %c0_39 = arith.constant 0 : index
    %c0_40 = arith.constant 0 : index
    %25 = vector.load %arg7[%c0_39, %c0_40] : memref<4x16xf32, #tpu.memory_space<vmem>>, vector<4x16xf32>
    tpu.vector_store %arg7[%c0_39, %c0_40], %24 {strides = array<i32>} : memref<4x16xf32, #tpu.memory_space<vmem>>, vector<4x16xf32>,
    %c0_41 = arith.constant 0 : index
    %c0_42 = arith.constant 0 : index
    %c0_43 = arith.constant 0 : index
    %c0_44 = arith.constant 0 : index
    %c3 = arith.constant 3 : index
    %26 = vector.load %arg3[%c0_41, %c0_42, %c0_43, %c0_44, %c3] : memref<1x1x1x1x20xf32, #tpu.memory_space<vmem>>, vector<1x1x1x1x16xf32>
    %27 = vector.shape_cast %26 : vector<1x1x1x1x16xf32> to vector<1x16xf32>
    %c0_45 = arith.constant 0 : index
    %c3_46 = arith.constant 3 : index
    %c0_47 = arith.constant 0 : index
    %c0_48 = arith.constant 0 : index
    %28 = vector.load %arg4[%c0_45, %c3_46, %c0_47, %c0_48] : memref<1x5x4x1xf32, #tpu.memory_space<vmem>>, vector<1x1x4x1xf32>
    %29 = vector.shape_cast %28 : vector<1x1x4x1xf32> to vector<4x1xf32>
    %c0_49 = arith.constant 0 : index
    %c0_50 = arith.constant 0 : index
    %30 = vector.load %arg7[%c0_49, %c0_50] : memref<4x16xf32, #tpu.memory_space<vmem>>, vector<4x16xf32>
    %cst_51 = arith.constant dense<0.000000e+00> : vector<4x16xf32>
    %31 = tpu.matmul %29, %27, %cst_51 {dimension_numbers = #tpu.dot_dimension_numbers<[1], [0], [0], [1], [0, 0, 1, 1], [], []>} : vector<4x1xf32>, vector<1x16xf32>, vector<4x16xf32> -> vector<4x16xf32>
    %32 = arith.addf %30, %31 : vector<4x16xf32>
    %c0_52 = arith.constant 0 : index
    %c0_53 = arith.constant 0 : index
    %33 = vector.load %arg7[%c0_52, %c0_53] : memref<4x16xf32, #tpu.memory_space<vmem>>, vector<4x16xf32>
    tpu.vector_store %arg7[%c0_52, %c0_53], %32 {strides = array<i32>} : memref<4x16xf32, #tpu.memory_space<vmem>>, vector<4x16xf32>,
    %c0_54 = arith.constant 0 : index
    %c0_55 = arith.constant 0 : index
    %c0_56 = arith.constant 0 : index
    %c0_57 = arith.constant 0 : index
    %c4 = arith.constant 4 : index
    %34 = vector.load %arg3[%c0_54, %c0_55, %c0_56, %c0_57, %c4] : memref<1x1x1x1x20xf32, #tpu.memory_space<vmem>>, vector<1x1x1x1x16xf32>
    %35 = vector.shape_cast %34 : vector<1x1x1x1x16xf32> to vector<1x16xf32>
    %c0_58 = arith.constant 0 : index
    %c4_59 = arith.constant 4 : index
    %c0_60 = arith.constant 0 : index
    %c0_61 = arith.constant 0 : index
    %36 = vector.load %arg4[%c0_58, %c4_59, %c0_60, %c0_61] : memref<1x5x4x1xf32, #tpu.memory_space<vmem>>, vector<1x1x4x1xf32>
    %37 = vector.shape_cast %36 : vector<1x1x4x1xf32> to vector<4x1xf32>
    %c0_62 = arith.constant 0 : index
    %c0_63 = arith.constant 0 : index
    %38 = vector.load %arg7[%c0_62, %c0_63] : memref<4x16xf32, #tpu.memory_space<vmem>>, vector<4x16xf32>
    %cst_64 = arith.constant dense<0.000000e+00> : vector<4x16xf32>
    %39 = tpu.matmul %37, %35, %cst_64 {dimension_numbers = #tpu.dot_dimension_numbers<[1], [0], [0], [1], [0, 0, 1, 1], [], []>} : vector<4x1xf32>, vector<1x16xf32>, vector<4x16xf32> -> vector<4x16xf32>
    %40 = arith.addf %38, %39 : vector<4x16xf32>
    %c0_65 = arith.constant 0 : index
    %c0_66 = arith.constant 0 : index
    %41 = vector.load %arg7[%c0_65, %c0_66] : memref<4x16xf32, #tpu.memory_space<vmem>>, vector<4x16xf32>
    tpu.vector_store %arg7[%c0_65, %c0_66], %40 {strides = array<i32>} : memref<4x16xf32, #tpu.memory_space<vmem>>, vector<4x16xf32>,
    %c0_67 = arith.constant 0 : index
    %c0_68 = arith.constant 0 : index
    %42 = vector.load %arg7[%c0_67, %c0_68] : memref<4x16xf32, #tpu.memory_space<vmem>>, vector<4x16xf32>
    %c0_69 = arith.constant 0 : index
    %c0_70 = arith.constant 0 : index
    %c0_71 = arith.constant 0 : index
    %43 = vector.load %arg5[%c0_69, %c0_70, %c0_71] : memref<1x4x1xf32, #tpu.memory_space<vmem>>, vector<1x4x1xf32>
    %44 = vector.shape_cast %43 : vector<1x4x1xf32> to vector<4x1xf32>
    %45 = vector.broadcast %44 : vector<4x1xf32> to vector<4x16xf32>
    %46 = arith.addf %42, %45 : vector<4x16xf32>
    %cst_72 = arith.constant 0.000000e+00 : f32
    %47 = vector.broadcast %cst_72 : f32 to vector<4x16xf32>
    %48 = arith.cmpf oge, %46, %47 : vector<4x16xf32>
    %cst_73 = arith.constant 1.000000e-01 : f32
    %49 = vector.broadcast %cst_73 : f32 to vector<4x16xf32>
    %50 = arith.mulf %49, %46 : vector<4x16xf32>
    %51 = arith.select %48, %46, %50 : vector<4x16xi1>, vector<4x16xf32>
    %c0_74 = arith.constant 0 : index
    %c0_75 = arith.constant 0 : index
    %c0_76 = arith.constant 0 : index
    %c0_77 = arith.constant 0 : index
    %52 = vector.load %arg6[%c0_74, %c0_75, %c0_76, %c0_77] : memref<1x1x4x16xf32, #tpu.memory_space<vmem>>, vector<1x1x4x16xf32>
    %53 = vector.shape_cast %52 : vector<1x1x4x16xf32> to vector<4x16xf32>
    %54 = vector.shape_cast %51 : vector<4x16xf32> to vector<1x1x4x16xf32>
    tpu.vector_store %arg6[%c0_74, %c0_75, %c0_76, %c0_77], %54 {strides = array<i32>} : memref<1x1x4x16xf32, #tpu.memory_space<vmem>>, vector<1x1x4x16xf32>,
    return
  }
  func.func @transform_0(%arg0: i32, %arg1: i32, %arg2: i32) -> (i32, i32, i32, i32, i32) {
    %c0_i32 = arith.constant 0 : i32
    %c0_i32_0 = arith.constant 0 : i32
    %c0_i32_1 = arith.constant 0 : i32
    %c0_i32_2 = arith.constant 0 : i32
    return %arg1, %arg0, %c0_i32, %c0_i32_0, %c0_i32_1 : i32, i32, i32, i32, i32
  }
  func.func @transform_1(%arg0: i32, %arg1: i32, %arg2: i32) -> (i32, i32, i32, i32) {
    %c0_i32 = arith.constant 0 : i32
    %c0_i32_0 = arith.constant 0 : i32
    %c0_i32_1 = arith.constant 0 : i32
    %c0_i32_2 = arith.constant 0 : i32
    return %arg0, %c0_i32, %c0_i32_0, %c0_i32_1 : i32, i32, i32, i32
  }
  func.func @transform_2(%arg0: i32, %arg1: i32, %arg2: i32) -> (i32, i32, i32) {
    %c0_i32 = arith.constant 0 : i32
    %c0_i32_0 = arith.constant 0 : i32
    %c0_i32_1 = arith.constant 0 : i32
    return %arg0, %c0_i32, %c0_i32_0 : i32, i32, i32
  }
  func.func @transform_3(%arg0: i32, %arg1: i32, %arg2: i32) -> (i32, i32, i32, i32) {
    %c0_i32 = arith.constant 0 : i32
    %c0_i32_0 = arith.constant 0 : i32
    return %arg1, %arg0, %c0_i32, %arg2 : i32, i32, i32, i32
  }
}

</mosaic_0001>

<bundles_post_ra>
// kernel: tpu_custom_call.1
= control target key start
LH: loop header
LB: loop body
LE: loop exit
PB: predicated region body
PF: predicated region fallthrough
CT: control target
= control target key end

     0   :  { %8 = vsyncpa [#allocation4], 0  ;;  %s1180_s0 = inlined_call_operand.vmem [shape: f32[2,1,1,1,20], index: 0, kind: input, shape index: {}]   ;;  %s1181_s1 = inlined_call_operand.vmem [shape: f32[1,5,4,1], index: 1, kind: input, shape index: {}]   ;;  %s1182_s2 = inlined_call_operand.vmem [shape: f32[1,4,1], index: 2, kind: input, shape index: {}]   ;;  %s1183_s3 = inlined_call_operand.hbm [shape: f32[2,1,4,16], index: 3, kind: output, shape index: {}]  }
   0x1   :  { %10 = vsyncpa [#allocation4 + $0x1], 0  ;;  %s1035_s12 = smov 0   ;;  %s1037_s13 = smov 0  }
   0x2   :  { %s1039_s14 = smov 0   ;;  %s1041_s15 = smov 0  }
   0x3   :  { %s1043_s16 = smov 0   ;;  %s1045_s17 = smov 0  }
   0x4 LB: > { %s801_s18 = sadd.s32 4294967295, %s1005_s17   ;;  %s802_s19 = sadd.s32 4294967294, %s1005_s17   ;;  %s1005_s17 = sphi %s1045_s17, %s16_s17   ;;  %s1001_s16 = sphi %s1043_s16, %s1190_s16   ;;  %s997_s15 = sphi %s1041_s15, %s1189_s15   ;;  %s993_s14 = sphi %s1039_s14, %s1188_s14   ;;  %s989_s13 = sphi %s1037_s13, %s1187_s13   ;;  %s985_s12 = sphi %s1035_s12, %s1186_s12  }
   0x5   : > { %s31_s20 = sadd.s32 1, %s1001_s16  ;;  %s126_s21 = sadd.s32 1, %s993_s14 }
   0x6   : > { %p33_p0 = scmp.ge.s32.totalorder %s31_s20, 2  ;;  %p136_p1 = scmp.ne.s32.totalorder %s993_s14, %s989_s13 }
   0x7   : > { %p137_p2 = scmp.eq.s32.totalorder %s801_s18, 1  ;;  %p142_p3 = scmp.ne.s32.totalorder %s989_s13, %s985_s12 }
   0x8   : > { %s1192_s20 = smov (%p33_p0, %s31_s20), 0  ;;  %p143_p5 = scmp.eq.s32.totalorder %s802_s19, 1 }
   0x9   : > { %p1075_p4 = por %p137_p2, %p136_p1  ;;  %s119_s23 = ssub.s32 %s1001_s16, %s1192_s20 }
   0xa   : > { %p807_p6 = scmp.ge.s32.totalorder %s1005_s17, 1  ;;  %p124_p7 = scmp.eq.s32.totalorder %s119_s23, 0 }
   0xb   : > { %p1082_p8 = por %p143_p5, %p142_p3  ;;  %p185_p9 = scmp.lt.s32.totalorder %s1005_s17, 3 }
   0xc   : > { %s1088_s25 = scalar_select %p124_p7, %s993_s14, %s126_s21  }
   0xd   : > { %p186_p10 = pnand %p807_p6, %p185_p9 }
   0xe   : > { %p219_p11 = scmp.lt.s32.totalorder (!%p186_p10), %s997_s15, 1  ;;  %s1010_s5 = smov (!%p186_p10), 127  }
   0xf   : > { %189 = sbr.rel (%p186_p10) target bundleno = 391 (0x187), region = 32  ;;  %s1011_s6 = smov (!%p186_p10), 125  }
  0x10   : > { %s1012_s7 = smov (!%p186_p10), 126   ;;  %s1013_s8 = smov (!%p186_p10), 124  }
  0x11   : > { %s828_s4 = sshll.u32 (!%p186_p10), %s997_s15, 6 }
  0x12   : > { %s1139_s9 = scalar_lea.hbm (!%p186_p10), %s1183_s3, %s828_s4 }
  0x14   : > { %v1007_v0 = vmov 0.0   ;;  %vm1008_vm0 = vmmov 0   ;;  %s220_s26 = scalar_select %p219_p11, %s997_s15, 1  ;;  %v1009_v1 = vmov 0   ;;  %vm234_vm1 = vcmask 125952  }
  0x15   : > { %841 = vmatprep.subr.mxu0 %v1007_v0  ;;  %843 = vmatprep.mubr.msk.f32.mxu0 %vm1008_vm0, %v1007_v0  ;;  %vm243_vm2 = vcmask 1040384   ;;  %vm239_vm3 = vcmask 7168   ;;  %235 = vst.msk [vmem:[#allocation2] sm:$0xf] %vm234_vm1, %v1007_v0  ;;  %v237_v4 = vld [vmem:[%s1181_s1] sm:$0xf] }
  0x16   : > { %846 = vmatprep.subr.mxu1 %v1007_v0  ;;  %848 = vmatprep.mubr.msk.f32.mxu1 %vm1008_vm0, %v1007_v0  ;;  %s224_s29 = scalar_lea.vmem %s1180_s0, %s220_s26  ;;  %v672_v5 = vld [vmem:[%s1182_s2] sm:$0xf]  ;;  %v811_v6 = vld [vmem:[%s1181_s1 + $0x4] sm:$0xf]  ;;  %v815_v9 = vld [vmem:[%s1181_s1 + $0x8] sm:$0xf] }
  0x17   : > { %928 = vset.pattern.permute.xlu0 %v1009_v1  ;;  %v812_v2 = vld [vmem:[%s224_s29] ss:$0 sm:$0xff]  ;;  %v819_v10 = vld [vmem:[%s1181_s1 + $0xc] sm:$0xf]  ;;  %v823_v13 = vld [vmem:[%s1181_s1 + $0x10] sm:$0xf] }
  0x18   : > { %v236_v3 = vld [vmem:[%s224_s29] sm:$0x1]  ;;  %328 = vrot.lane.b32.xlu0 %v812_v2, %s1010_s5  ;;  %504 = vrot.lane.b32.xlu1 %v812_v2, %s1011_s6  ;;  %s216_s29 = sand.u32 1, %s989_s13   ;;  %s1014_s15 = smov [#allocation3]  }
  0x19   : > { %842 = vmatpush3.msk.msra.mxu0 %vm243_vm2, %v236_v3  ;;  %s808_s30 = sshll.u32 %s216_s29, 2  ;;  %s684_s10 = scalar_lea.sflag [#allocation4], %s216_s29 }
  0x1a   : > { %844 = vmatmul.mubr.msk.f32.vlgmr.msra.gmra.mxu0 %vm239_vm3, %v237_v4  ;;  %851 = vmatprep.subr.mxu0 %v1007_v0  ;;  %s218_s5 = scalar_lea.vmem [#allocation3], %s808_s30  ;;  %s933_s18 = sshll.u32 %s1014_s15, 4  ;;  %s934_s18 = int_to_ptr.vmem [resolvable:$false] %s933_s18 }
  0x1b   : > { %853 = vmatprep.mubr.msk.f32.mxu0 %vm1008_vm0, %v1007_v0  ;;  %s699_s6 = sshll.u32 %s218_s5, 4  ;;  %s935_s19 = scalar_lea.vmem %s934_s18, 128  ;;  %s700_s6 = int_to_ptr.vmem [resolvable:$true] %s699_s6 }
  0x1c   : > { %416 = vrot.lane.b32.xlu0 %v812_v2, %s1012_s7  ;;  %592 = vrot.lane.b32.xlu1 %v812_v2, %s1013_s8  ;;  %v238_v14 = vld [vmem:[#allocation2] sm:$0xf]  ;;  %s929_s11 = scalar_lea.vmem %s700_s6, 64  ;;  %p936_p1 = scmp.lt.s32.totalorder %s700_s6, %s934_s18 }
  0x1d   : > { %p930_p12 = scmp.ne.s32.totalorder %s700_s6, %s929_s11  ;;  %p937_p2 = scmp.lt.s32.totalorder %s935_s19, %s929_s11 }
  0x1f   : > { %p931_p13 = pnand %p930_p12, %p1075_p4  ;;  %p938_p3 = por %p937_p2, %p936_p1 }
  0x20   : > { %675 = vperm.xlu0 %928, %v672_v5  }
  0x21   : > { %p932_p0 = pneg %p931_p13 }
  0x23   : > { %p939_p5 = pnand %p938_p3, %p932_p0 }
  0x8a   : > { %v329_v7 = vpop.permute.xlu0 %328  ;;  %v505_v8 = vpop.permute.xlu1 %504 }
  0x8b   : > { %847 = vmatpush3.msk.msra.mxu1 %vm243_vm2, %v329_v7 }
  0x8c   : > { %849 = vmatmul.mubr.msk.f32.vlgmr.msra.gmra.mxu1 %vm239_vm3, %v811_v6  ;;  %856 = vmatprep.subr.mxu1 %v1007_v0 }
  0x8d   : > { %857 = vmatpush3.msk.msra.mxu1 %vm243_vm2, %v505_v8  ;;  %858 = vmatprep.mubr.msk.f32.mxu1 %vm1008_vm0, %v1007_v0 }
  0x8e   : > { %v417_v11 = vpop.permute.xlu0 %416  ;;  %v593_v12 = vpop.permute.xlu1 %592 }
  0x8f   : > { %852 = vmatpush3.msk.msra.mxu0 %vm243_vm2, %v417_v11 }
  0x90   : > { %854 = vmatmul.mubr.msk.f32.vlgmr.msra.gmra.mxu0 %vm239_vm3, %v815_v9  ;;  %859 = vmatmul.mubr.msk.f32.vlgmr.msra.gmra.mxu1 %vm239_vm3, %v819_v10 }
  0x91   : > { %861 = vmatprep.subr.mxu0 %v1007_v0  ;;  %863 = vmatprep.mubr.msk.f32.mxu0 %vm1008_vm0, %v1007_v0 }
  0x92   : > { %862 = vmatpush3.msk.msra.mxu0 %vm243_vm2, %v593_v12 }
  0x94   : > { %864 = vmatmul.mubr.msk.f32.vlgmr.msra.gmra.mxu0 %vm239_vm3, %v823_v13 }
  0x9b   : > { %v676_v34 = vpop.permute.xlu0 %675 }
  0xda   : > { %v313_v15 = vpop.f32.mrf.mxu0 }
  0xdb   : > { %v317_v16 = vadd.f32 %v313_v15, %v238_v14 }
  0xdc   : > { %v845_v17 = vpop.f32.mrf.mxu0 }
  0xdd   : > { %318 = vst.msk [vmem:[#allocation2] sm:$0xf] %vm234_vm1, %v317_v16 }
  0xe4   : > { %v322_v18 = vld [vmem:[#allocation2] sm:$0xf] }
 0x14c   : > { %v401_v19 = vpop.f32.mrf.mxu1 }
 0x14d   : > { %v405_v20 = vadd.f32 %v401_v19, %v322_v18 }
 0x14e   : > { %v850_v21 = vpop.f32.mrf.mxu1 }
 0x14f   : > { %406 = vst.msk [vmem:[#allocation2] sm:$0xf] %vm234_vm1, %v405_v20 }
 0x150   : > { %v489_v22 = vpop.f32.mrf.mxu0  ;;  %v577_v23 = vpop.f32.mrf.mxu1 }
 0x152   : > { %v855_v24 = vpop.f32.mrf.mxu0  ;;  %v860_v25 = vpop.f32.mrf.mxu1 }
 0x154   : > { %v665_v26 = vpop.f32.mrf.mxu0 }
 0x156   : > { %v410_v27 = vld [vmem:[#allocation2] sm:$0xf]  ;;  %v865_v28 = vpop.f32.mrf.mxu0 }
 0x157   : > { %v493_v29 = vadd.f32 %v489_v22, %v410_v27 }
 0x159   : > { %494 = vst.msk [vmem:[#allocation2] sm:$0xf] %vm234_vm1, %v493_v29 }
 0x160   : > { %v498_v30 = vld [vmem:[#allocation2] sm:$0xf] }
 0x161   : > { %v581_v31 = vadd.f32 %v577_v23, %v498_v30 }
 0x163   : > { %582 = vst.msk [vmem:[#allocation2] sm:$0xf] %vm234_vm1, %v581_v31 }
 0x16a   : > { %v586_v32 = vld [vmem:[#allocation2] sm:$0xf] }
 0x16b   : > { %v669_v33 = vadd.f32 %v665_v26, %v586_v32 }
 0x16d   : > { %670 = vst.msk [vmem:[#allocation2] sm:$0xf] %vm234_vm1, %v669_v33 }
 0x174   : > { %v671_v35 = vld [vmem:[#allocation2] sm:$0xf] }
 0x175   : > { %v678_v36 = vadd.f32 %v676_v34, %v671_v35 }
 0x177   : > { %vm679_vm4 = vcmp.ge.f32.partialorder %v678_v36, 0.0  ;;  %v680_v37 = vmul.f32 0.1, %v678_v36 }
 0x179   : > { %v681_v38 = vsel %vm679_vm4, %v678_v36, %v680_v37 }
 0x17a   : > { %682 = vst.msk [vmem:[%s218_s5] sm:$0xf] %vm234_vm1, %v681_v38 }
 0x17b   : > { %942 = shalt.err (!%p939_p5)
}
 0x17c   : > { %s943_s21 = scalar_lea.hbm %s1139_s9, 64  ;;  %s947_s27 = scalar_lea.hbm %s1183_s3, 128 }
 0x17d   : > { %p944_p6 = scmp.ne.s32.totalorder %s1139_s9, %s943_s21  ;;  %p948_p10 = scmp.lt.s32.totalorder %s1139_s9, %s1183_s3 }
 0x17e   : > { %p949_p11 = scmp.lt.s32.totalorder %s947_s27, %s943_s21 }
 0x17f   : > { %p945_p7 = pnand %p944_p6, %p1075_p4 }
 0x180   : > { %p950_p12 = por %p949_p11, %p948_p10 }
 0x181   : > { %p946_p9 = pneg %p945_p7 }
 0x183   : > { %p951_p13 = pnand %p950_p12, %p946_p9 }
 0x185   : > { %954 = shalt.err (!%p951_p13)
}
 0x186   : > { %866 = dma.vmem_to_hbm [thread:$0]  (%p1075_p4), %s700_s6, 64, %s1139_s9, %s684_s10  }
 0x187 PF: > { %p872_p0 = scmp.ge.s32.totalorder %s1005_s17, 2  ;;  %s711_s30 = sand.u32 1, %s985_s12  }
 0x188   : > { %s712_s4 = scalar_lea.sflag [#allocation4], %s711_s30 }
 0x189   : > { %p869_p1 = pnand %p872_p0, %p1082_p8 }
 0x18b   : > { %p870_p2 = pneg %p869_p1 }
 0x18d   : > { %980 = dma.done.wait (%p870_p2), %s712_s4, 64  }
 0x18e   : > { %982 = vsyncadd (%p870_p2), %s712_s4, 4294967232  ;;  %s16_s17 = sadd.s32 1, %s1005_s17   ;;  %s1186_s12 = smov %s989_s13 }
 0x18f   : > { %p13_p3 = scmp.ge.s32.totalorder %s16_s17, 4   ;;  %s1187_s13 = smov %s993_s14 }
 0x190   : > { %s1188_s14 = smov %s1088_s25  ;;  %s1189_s15 = smov %s1001_s16 }
 0x191   : > { %s1190_s16 = smov %s1192_s20  ;;  %15 = sbr.rel (!%p13_p3) target bundleno = 4 (0x4), region = 77 }
 0x196   :  { %717 = vsyncpa [#allocation4], 1 }
 0x197   :  { %719 = vsyncpa [#allocation4 + $0x1], 1 }

</bundles_post_ra>
